<compile_context>
chip_gen: v5e
topology: v5e:2x2
jax: 0.10.0
libtpu: 0.0.40
codegen_flags: <defaults>
</compile_context>

<pallas_src>
import jax
import jax.numpy as jnp
from jax.experimental import pallas as pl
from jax.experimental.pallas import tpu as pltpu


def _copy_kernel(x_ref, o_ref):
    # Both refs are identical 2-D VMEM tiles; this is a straight copy.
    o_ref[...] = x_ref[...]


def _generation_params():
    """(target block bytes, explicit vmem_limit_bytes or None), per TPU gen."""
    kind = ""
    try:
        kind = jax.devices()[0].device_kind.lower()
    except Exception:
        pass
    if "v6" in kind:
        # 32 MiB default scoped VMEM: 2x(in) + 2x(out) 6 MiB blocks = 24 MiB fits.
        return 6 * 1024 * 1024, None
    if "7" in kind:
        # v7x: 64 MiB physical VMEM, ~3.2 TB/s HBM -> bigger blocks, raise limit.
        return 8 * 1024 * 1024, 48 * 1024 * 1024
    # v5e (16 MiB default scoped limit) and unknown chips: stay conservative
    # (2x3 + 2x3 = 12 MiB peak with double-buffered in + out blocks).
    return 3 * 1024 * 1024, None


def _sublane_align(itemsize: int) -> int:
    # f32 -> 8 rows, bf16 -> 16, int8/fp8 -> 32 (sub-32-bit packs along sublanes).
    return max(8, 32 // max(1, itemsize))


def _tile_rows(n_rows: int, row_bytes: int, align: int, target_bytes: int) -> int:
    """Row tile: ~target_bytes per block, multiple of `align`, and >= 2 grid
    steps when the data is big enough (v7x has 2 TensorCores to feed)."""
    if n_rows <= align:
        return n_rows  # block equals the full dim -> always a legal block shape.
    tr = max(align, (target_bytes // max(1, row_bytes)) // align * align)
    if n_rows >= 2 * align:
        half = max(align, ((n_rows + 1) // 2) // align * align)
        tr = min(tr, half)  # guarantees pl.cdiv(n_rows, tr) >= 2
    return min(tr, n_rows)


def _copy_2d(slab: jax.Array, vmem_limit, target_bytes: int) -> jax.Array:
    """Pallas streaming copy of a 2-D slab, pipelined along the row axis."""
    n_rows, width = slab.shape
    itemsize = jnp.dtype(slab.dtype).itemsize
    align = _sublane_align(itemsize)
    tr = _tile_rows(n_rows, width * itemsize, align, target_bytes)
    grid = (pl.cdiv(n_rows, tr),)

    return pl.pallas_call(
        _copy_kernel,
        out_shape=jax.ShapeDtypeStruct((n_rows, width), slab.dtype),
        grid=grid,
        in_specs=[pl.BlockSpec((tr, width), lambda i: (i, 0))],
        out_specs=pl.BlockSpec((tr, width), lambda i: (i, 0)),
        compiler_params=pltpu.CompilerParams(
            dimension_semantics=("parallel",),
            vmem_limit_bytes=vmem_limit,
        ),
        cost_estimate=pl.CostEstimate(
            flops=0,
            transcendentals=0,
            bytes_accessed=2 * n_rows * width * itemsize,
        ),
    )(slab)


def squeeze_channels(x: jax.Array) -> jax.Array:
    """Pallas equivalent of torch.Tensor.squeeze(2) for 3-D (B, C, L) inputs."""
    assert x.ndim == 3, f"SqueezeChannels expects a 3-D tensor; got {x.shape}"
    B, C, L = x.shape
    if L != 1:
        # torch.squeeze(2) silently no-ops when dim 2 has size != 1.
        return x

    target_bytes, vmem_limit = _generation_params()
    total = B * C
    lane = 128
    if total % lane == 0:
        # Lane-dense path: view the contiguous (B, C, 1) buffer as a flat
        # (rows, 128) slab (free reshape), so stores are unmasked vst
        # regardless of the channel count C.
        slab = x.reshape(total // lane, lane)
    else:
        # Unaligned / tiny channel counts: copy the natural (B, C) view.
        # Stores are masked, but this is the launch-overhead-dominated tiny
        # regime where it does not matter.
        slab = x.reshape(B, C)

    out = _copy_2d(slab, vmem_limit, target_bytes)
    return out.reshape(B, C)


if __name__ == "__main__":
    key = jax.random.PRNGKey(0)
    k1, k2 = jax.random.split(key)

    # 1) Shape consistent with the module's use in CausalCNN: (batch=2, channels=4, 1).
    x = jax.random.normal(k1, (2, 4, 1), dtype=jnp.float32)
    y = squeeze_channels(x)
    jax.block_until_ready(y)
    ref = jnp.squeeze(x, axis=2)
    assert y.shape == (2, 4), y.shape
    assert y.dtype == x.dtype
    assert jnp.array_equal(y, ref), "mismatch vs reference squeeze (tiny path)"

    # 2) Lane-aligned shape to exercise the flat (rows, 128) lane-dense path.
    x2 = jax.random.normal(k2, (8, 128, 1), dtype=jnp.float32)
    y2 = squeeze_channels(x2)
    jax.block_until_ready(y2)
    ref2 = jnp.squeeze(x2, axis=2)
    assert y2.shape == (8, 128), y2.shape
    assert jnp.array_equal(y2, ref2), "mismatch vs reference squeeze (aligned path)"

    print("KERNEL_OK")
</pallas_src>

<mosaic_0001>
module attributes {stable_mosaic.version = 11 : i64} {
  func.func @_copy_kernel(%arg0: i32, %arg1: memref<2x4xf32, #tpu.memory_space<vmem>>, %arg2: memref<2x4xf32, #tpu.memory_space<vmem>>) attributes {dimension_semantics = [#tpu.dimension_semantics<parallel>], iteration_bounds = array<i64: 1>, scalar_prefetch = 0 : i64, scratch_operands = 0 : i64, tpu.core_type = #tpu.core_type<tc>, window_params = [{transform_indices = @transform_0, window_bounds = array<i64: 2, 4>}, {transform_indices = @transform_1, window_bounds = array<i64: 2, 4>}]} {
    %c0 = arith.constant 0 : index
    %c0_0 = arith.constant 0 : index
    %0 = vector.load %arg1[%c0, %c0_0] : memref<2x4xf32, #tpu.memory_space<vmem>>, vector<2x4xf32>
    %c0_1 = arith.constant 0 : index
    %c0_2 = arith.constant 0 : index
    %1 = vector.load %arg2[%c0_1, %c0_2] : memref<2x4xf32, #tpu.memory_space<vmem>>, vector<2x4xf32>
    tpu.vector_store %arg2[%c0_1, %c0_2], %0 {strides = array<i32>} : memref<2x4xf32, #tpu.memory_space<vmem>>, vector<2x4xf32>,
    return
  }
  func.func @transform_0(%arg0: i32) -> (i32, i32) {
    %c0_i32 = arith.constant 0 : i32
    %c0_i32_0 = arith.constant 0 : i32
    return %arg0, %c0_i32 : i32, i32
  }
  func.func @transform_1(%arg0: i32) -> (i32, i32) {
    %c0_i32 = arith.constant 0 : i32
    %c0_i32_0 = arith.constant 0 : i32
    return %arg0, %c0_i32 : i32, i32
  }
}

</mosaic_0001>

<bundles_post_ra>
// kernel: tpu_custom_call.1
= control target key start
LH: loop header
LB: loop body
LE: loop exit
PB: predicated region body
PF: predicated region fallthrough
CT: control target
= control target key end

     0   :  { %6 = vsyncpa [#allocation3], 0  ;;  %s115_s0 = inlined_call_operand.hbm [shape: f32[2,4], index: 0, kind: input, shape index: {}]   ;;  %s116_s1 = inlined_call_operand.hbm [shape: f32[2,4], index: 1, kind: output, shape index: {}]  }
   0x1   :  { %7 = vsyncpa [#allocation4], 0  ;;  %s13_s8 = sshll.u32 %s115_s0, 4  ;;  %s97_s9 = smov [#allocation2]   ;;  %s14_s8 = int_to_ptr.hbm [resolvable:$true] %s13_s8 }
   0x2   :  { %s15_s10 = sshll.u32 %s97_s9, 4  ;;  %s16_s10 = int_to_ptr.vmem [resolvable:$true] %s15_s10 }
   0x3   :  { %18 = dma.hbm_to_vmem [thread:$0]  %s14_s8, 32, %s16_s10, [#allocation3]  }
   0x4   :  { %93 = dma.done.wait [#allocation3], 32  }
   0x5   :  { %94 = vsyncadd [#allocation3], 4294967264  ;;  %s98_s11 = smov [#allocation5]   ;;  %s33_s15 = sshll.u32 %s116_s1, 4  ;;  %vm24_vm0 = vcmask 25600   ;;  %s34_s15 = int_to_ptr.hbm [resolvable:$true] %s33_s15 }
   0x6   :  { %s31_s12 = sshll.u32 %s98_s11, 4  ;;  %v23_v0 = vld [vmem:[#allocation2] sm:$0x3]  ;;  %s32_s12 = int_to_ptr.vmem [resolvable:$true] %s31_s12 }
   0x7   :  { %25 = vst.msk [vmem:[#allocation5] sm:$0x3] %vm24_vm0, %v23_v0 }
   0x8   :  { %36 = dma.vmem_to_hbm [thread:$0]  %s32_s12, 32, %s34_s15, [#allocation4]  }
   0x9   :  { %95 = dma.done.wait [#allocation4], 32  }
   0xa   :  { %96 = vsyncadd [#allocation4], 4294967264 }
   0xb   :  { %41 = vsyncpa [#allocation3], 1 }
   0xc   :  { %42 = vsyncpa [#allocation4], 1 }

</bundles_post_ra>
